<compile_context>
chip_gen: v7x
topology: tpu7x:2x2x1
jax: 0.10.0
libtpu: 0.0.40
codegen_flags: <defaults>
</compile_context>

<pallas_src>
import jax
import jax.numpy as jnp
from jax.experimental import pallas as pl
from jax.experimental.pallas import tpu as pltpu

IN_DIM = 2048
CONV_DIM = 64    # hidden size of fc1
OUT_DIM = 1

# f32 tile: 1024 rows * 2048 feats * 4 B = 8 MiB per x buffer (double-buffered).
BATCH_TILE_F32 = 1024
# bf16 tile: same 8 MiB per buffer at half the bytes/row.
BATCH_TILE_BF16 = 2048


def _round_up(x, m):
    return ((x + m - 1) // m) * m


def v_kernel(x_ref, w1_ref, b1_ref, w2_ref, b2_ref, o_ref):
    # fc1: (TB, 2048) @ (2048, 64) on the MXU, f32 accumulation.
    h = jnp.dot(x_ref[...], w1_ref[...], preferred_element_type=jnp.float32)
    h = h + b1_ref[...]                      # (TB, 64) + (1, 64) broadcast
    h = jnp.where(h >= 0, h, 0.2 * h)        # LeakyReLU(0.2) on the VPU (f32)
    # fc2: Linear(64 -> 1).  N=1, K=64 is a badly shaped MXU op, so use a VPU
    # multiply + lane reduction; b2 is a scalar read from SMEM.
    o = jnp.sum(h * w2_ref[...], axis=-1) + b2_ref[0, 0]     # (TB,)
    # Lane-dense store: (1, TB) slab instead of a (TB, 1) block that would
    # lower to masked single-lane stores.
    o_ref[...] = o[None, :].astype(o_ref.dtype)


def _choose_tile(B, batch_tile):
    """Pick (tile_rows, grid_steps) without padding x.

    - B <= 256: one block covering the whole array (block dims == array dims,
      so the (8,128) constraint is satisfied regardless of B).
    - B > 256: at least 2 grid steps (v7x megacore), tile rows a multiple of
      128 (keeps the lane-dense output block aligned), capped at batch_tile.
      The last block may be ragged; Pallas masks it.
    """
    if B <= 256:
        return B, 1
    n_steps = max(2, pl.cdiv(B, batch_tile))
    tb = min(_round_up(pl.cdiv(B, n_steps), 128), batch_tile)
    return tb, pl.cdiv(B, tb)


def v_forward(x, w1, b1, w2, b2):
    """Forward pass of V.

    x:  (..., 2048) float32 or bfloat16 (bf16 x in HBM => halved HBM traffic)
    w1: (2048, 64)  -- fc1.weight, pre-transposed to (in, out)
    b1: (1, 64)     -- fc1.bias
    w2: (1, 64)     -- fc2.weight, PyTorch layout (out, in)
    b2: (1, 1)      -- fc2.bias
    returns (..., 1) float32.
    """
    lead = x.shape[:-1]
    assert x.shape[-1] == IN_DIM, x.shape
    x = x.reshape(-1, IN_DIM)
    B = x.shape[0]

    # IMPORTANT: never cast x here -- an XLA-side cast of the dominant stream
    # would read f32 + write bf16 + re-read bf16 (~2x the HBM bytes of just
    # reading f32).  Only the tiny w1 (512 KiB) is matched to x's dtype.
    if w1.dtype != x.dtype:
        w1 = w1.astype(x.dtype)

    batch_tile = BATCH_TILE_BF16 if x.dtype.itemsize <= 2 else BATCH_TILE_F32
    tb, grid_steps = _choose_tile(B, batch_tile)

    bytes_accessed = (
        B * IN_DIM * x.dtype.itemsize            # x (dominant term)
        + IN_DIM * CONV_DIM * w1.dtype.itemsize  # w1 (resident)
        + 2 * CONV_DIM * 4 + 4                   # b1, w2, b2
        + B * 4)                                 # output
    cost = pl.CostEstimate(
        flops=2 * B * IN_DIM * CONV_DIM + 4 * B * CONV_DIM,
        transcendentals=0,
        bytes_accessed=bytes_accessed)

    out = pl.pallas_call(
        v_kernel,
        out_shape=jax.ShapeDtypeStruct((1, B), jnp.float32),
        grid_spec=pltpu.PrefetchScalarGridSpec(
            num_scalar_prefetch=0,
            grid=(grid_steps,),
            in_specs=[
                pl.BlockSpec((tb, IN_DIM), lambda i: (i, 0)),        # x tile (pipelined)
                pl.BlockSpec((IN_DIM, CONV_DIM), lambda i: (0, 0)),  # w1 (resident)
                pl.BlockSpec((1, CONV_DIM), lambda i: (0, 0)),       # b1
                pl.BlockSpec((1, CONV_DIM), lambda i: (0, 0)),       # w2 row
                pl.BlockSpec((1, 1), lambda i: (0, 0),
                             memory_space=pltpu.MemorySpace.SMEM),   # b2 scalar
            ],
            out_specs=pl.BlockSpec((1, tb), lambda i: (0, i)),       # lane-dense slab
        ),
        compiler_params=pltpu.CompilerParams(
            dimension_semantics=("parallel",),
            # v5e's default scoped-VMEM limit is 16 MiB; the f32 tiling needs
            # ~17-18 MiB, so request 32 MiB (default on v6e/v7x, well inside
            # every generation's physical VMEM).
            vmem_limit_bytes=32 * 1024 * 1024),
        cost_estimate=cost,
    )(x, w1, b1, w2, b2)

    # (1, B) lane-dense slab -> (..., 1) to match the PyTorch module's output.
    return out[0, :, None].reshape(*lead, OUT_DIM)


def init_params(key, conv_dim=CONV_DIM):
    """Deterministic init mimicking PyTorch Linear default (uniform +-1/sqrt(fan_in))."""
    k1, k2, k3, k4 = jax.random.split(key, 4)
    bound1 = 1.0 / jnp.sqrt(IN_DIM)
    bound2 = 1.0 / jnp.sqrt(conv_dim)
    # w1 stored as (in, out) = transpose of PyTorch's (out, in) fc1 weight.
    w1 = jax.random.uniform(k1, (IN_DIM, conv_dim), jnp.float32, -bound1, bound1)
    b1 = jax.random.uniform(k2, (1, conv_dim), jnp.float32, -bound1, bound1)
    # w2 stored exactly as PyTorch's fc2.weight: (out=1, in=conv_dim).
    w2 = jax.random.uniform(k3, (1, conv_dim), jnp.float32, -bound2, bound2)
    b2 = jax.random.uniform(k4, (1, OUT_DIM), jnp.float32, -bound2, bound2)
    return w1, b1, w2, b2


def v_reference(x, w1, b1, w2, b2):
    h = x @ w1 + b1
    h = jnp.where(h >= 0, h, 0.2 * h)
    return h @ w2.T + b2


if __name__ == "__main__":
    key = jax.random.PRNGKey(0)
    kx, kx2, kp = jax.random.split(key, 3)
    w1, b1, w2, b2 = init_params(kp)

    # Small single-block case.
    B = 8
    x = jax.random.normal(kx, (B, IN_DIM), dtype=jnp.float32)
    out = jax.block_until_ready(v_forward(x, w1, b1, w2, b2))
    ref = v_reference(x, w1, b1, w2, b2)
    assert out.shape == (B, OUT_DIM), out.shape
    assert jnp.allclose(out, ref, atol=1e-4, rtol=1e-4), "mismatch vs reference (B=8)"

    # Non-divisible batch: exercises the 2-step grid + ragged last block path
    # (no jnp.pad of x, padded lanes of the output are simply never written).
    B2 = 300
    x2 = jax.random.normal(kx2, (B2, IN_DIM), dtype=jnp.float32)
    out2 = jax.block_until_ready(v_forward(x2, w1, b1, w2, b2))
    ref2 = v_reference(x2, w1, b1, w2, b2)
    assert out2.shape == (B2, OUT_DIM), out2.shape
    assert jnp.allclose(out2, ref2, atol=1e-4, rtol=1e-4), "mismatch vs reference (B=300)"

    print("KERNEL_OK")
</pallas_src>

<mosaic_0001>
module attributes {stable_mosaic.version = 11 : i64} {
  func.func @v_kernel(%arg0: i32, %arg1: memref<8x2048xf32, #tpu.memory_space<vmem>>, %arg2: memref<2048x64xf32, #tpu.memory_space<vmem>>, %arg3: memref<1x64xf32, #tpu.memory_space<vmem>>, %arg4: memref<1x64xf32, #tpu.memory_space<vmem>>, %arg5: memref<1x1xf32, #tpu.memory_space<smem>>, %arg6: memref<1x8xf32, #tpu.memory_space<vmem>>) attributes {dimension_semantics = [#tpu.dimension_semantics<parallel>], iteration_bounds = array<i64: 1>, scalar_prefetch = 0 : i64, scratch_operands = 0 : i64, tpu.core_type = #tpu.core_type<tc>, window_params = [{transform_indices = @transform_0, window_bounds = array<i64: 8, 2048>}, {pipeline_mode = #tpu.pipeline_mode<synchronous>, transform_indices = @transform_1, window_bounds = array<i64: 2048, 64>}, {pipeline_mode = #tpu.pipeline_mode<synchronous>, transform_indices = @transform_2, window_bounds = array<i64: 1, 64>}, {pipeline_mode = #tpu.pipeline_mode<synchronous>, transform_indices = @transform_3, window_bounds = array<i64: 1, 64>}, {transform_indices = @transform_4, window_bounds = array<i64: 1, 1>}, {transform_indices = @transform_5, window_bounds = array<i64: 1, 8>}]} {
    %c0 = arith.constant 0 : index
    %c0_0 = arith.constant 0 : index
    %0 = vector.load %arg1[%c0, %c0_0] : memref<8x2048xf32, #tpu.memory_space<vmem>>, vector<8x2048xf32>
    %c0_1 = arith.constant 0 : index
    %c0_2 = arith.constant 0 : index
    %1 = vector.load %arg2[%c0_1, %c0_2] : memref<2048x64xf32, #tpu.memory_space<vmem>>, vector<2048x64xf32>
    %cst = arith.constant dense<0.000000e+00> : vector<8x64xf32>
    %2 = tpu.matmul %0, %1, %cst {dimension_numbers = #tpu.dot_dimension_numbers<[1], [0], [0], [1], [0, 0, 1, 1], [], []>} : vector<8x2048xf32>, vector<2048x64xf32>, vector<8x64xf32> -> vector<8x64xf32>
    %c0_3 = arith.constant 0 : index
    %c0_4 = arith.constant 0 : index
    %3 = vector.load %arg3[%c0_3, %c0_4] : memref<1x64xf32, #tpu.memory_space<vmem>>, vector<1x64xf32>
    %4 = vector.broadcast %3 : vector<1x64xf32> to vector<8x64xf32>
    %5 = arith.addf %2, %4 : vector<8x64xf32>
    %cst_5 = arith.constant 0.000000e+00 : f32
    %6 = vector.broadcast %cst_5 : f32 to vector<8x64xf32>
    %7 = arith.cmpf oge, %5, %6 : vector<8x64xf32>
    %cst_6 = arith.constant 2.000000e-01 : f32
    %8 = vector.broadcast %cst_6 : f32 to vector<8x64xf32>
    %9 = arith.mulf %8, %5 : vector<8x64xf32>
    %10 = arith.select %7, %5, %9 : vector<8x64xi1>, vector<8x64xf32>
    %c0_7 = arith.constant 0 : index
    %c0_8 = arith.constant 0 : index
    %11 = vector.load %arg4[%c0_7, %c0_8] : memref<1x64xf32, #tpu.memory_space<vmem>>, vector<1x64xf32>
    %12 = vector.broadcast %11 : vector<1x64xf32> to vector<8x64xf32>
    %13 = arith.mulf %10, %12 : vector<8x64xf32>
    %cst_9 = arith.constant dense<0.000000e+00> : vector<8xf32>
    %14 = vector.multi_reduction <add>, %13, %cst_9 [1] : vector<8x64xf32> to vector<8xf32>
    %c0_10 = arith.constant 0 : index
    %c0_11 = arith.constant 0 : index
    %15 = memref.load %arg5[%c0_10, %c0_11] : memref<1x1xf32, #tpu.memory_space<smem>>
    %16 = vector.broadcast %15 : f32 to vector<8xf32>
    %17 = arith.addf %14, %16 : vector<8xf32>
    %18 = vector.shape_cast %17 : vector<8xf32> to vector<1x8xf32>
    %c0_12 = arith.constant 0 : index
    %c0_13 = arith.constant 0 : index
    %19 = vector.load %arg6[%c0_12, %c0_13] : memref<1x8xf32, #tpu.memory_space<vmem>>, vector<1x8xf32>
    tpu.vector_store %arg6[%c0_12, %c0_13], %18 {strides = array<i32>} : memref<1x8xf32, #tpu.memory_space<vmem>>, vector<1x8xf32>,
    return
  }
  func.func @transform_0(%arg0: i32) -> (i32, i32) {
    %c0_i32 = arith.constant 0 : i32
    %c0_i32_0 = arith.constant 0 : i32
    return %arg0, %c0_i32 : i32, i32
  }
  func.func @transform_1(%arg0: i32) -> (i32, i32) {
    %c0_i32 = arith.constant 0 : i32
    %c0_i32_0 = arith.constant 0 : i32
    %c0_i32_1 = arith.constant 0 : i32
    return %c0_i32, %c0_i32_0 : i32, i32
  }
  func.func @transform_2(%arg0: i32) -> (i32, i32) {
    %c0_i32 = arith.constant 0 : i32
    %c0_i32_0 = arith.constant 0 : i32
    %c0_i32_1 = arith.constant 0 : i32
    return %c0_i32, %c0_i32_0 : i32, i32
  }
  func.func @transform_3(%arg0: i32) -> (i32, i32) {
    %c0_i32 = arith.constant 0 : i32
    %c0_i32_0 = arith.constant 0 : i32
    %c0_i32_1 = arith.constant 0 : i32
    return %c0_i32, %c0_i32_0 : i32, i32
  }
  func.func @transform_4(%arg0: i32) -> (i32, i32) {
    %c0_i32 = arith.constant 0 : i32
    %c0_i32_0 = arith.constant 0 : i32
    %c0_i32_1 = arith.constant 0 : i32
    return %c0_i32, %c0_i32_0 : i32, i32
  }
  func.func @transform_5(%arg0: i32) -> (i32, i32) {
    %c0_i32 = arith.constant 0 : i32
    %c0_i32_0 = arith.constant 0 : i32
    return %c0_i32, %arg0 : i32, i32
  }
}

</mosaic_0001>

<bundles_post_ra>
// kernel: tpu_custom_call.1
= control target key start
LH: loop header
LB: loop body
LE: loop exit
PB: predicated region body
PF: predicated region fallthrough
CT: control target
= control target key end

     0   :  { %s2334_s0 = inlined_call_operand.vmem [shape: f32[8,2048], index: 0, kind: input, shape index: {}]   ;;  %s2335_s1 = inlined_call_operand.vmem [shape: f32[2048,64], index: 1, kind: input, shape index: {}]   ;;  %s2336_s2 = inlined_call_operand.vmem [shape: f32[1,64], index: 2, kind: input, shape index: {}]   ;;  %s2337_s3 = inlined_call_operand.vmem [shape: f32[1,64], index: 3, kind: input, shape index: {}]   ;;  %s2338_s4 = inlined_call_operand.<no memory space> [shape: f32[1,1], index: 4, kind: input, shape index: {}]   ;;  %s2339_s5 = inlined_call_operand.hbm [shape: f32[1,8], index: 5, kind: output, shape index: {}]  }
   0x1   :  { %v54_v0 = vld [vmem:[%s2335_s1 + $0x80] sm:$0xff]  ;;  %v55_v1 = vld [vmem:[%s2335_s1 + $0x88] sm:$0xff]  ;;  %v56_v11 = vld [vmem:[%s2335_s1 + $0x90] sm:$0xff] }
   0x2   :  { %v38_v2 = vld [vmem:[%s2335_s1] sm:$0xff]  ;;  %v1185_v3 = vpack.c.bf16 %v55_v1, %v54_v0  ;;  %v39_v4 = vld [vmem:[%s2335_s1 + $0x8] sm:$0xff]  ;;  %v57_v13 = vld [vmem:[%s2335_s1 + $0x98] sm:$0xff] }
   0x3   :  { %v86_v5 = vld [vmem:[%s2335_s1 + $0x180] sm:$0xff]  ;;  %v87_v6 = vld [vmem:[%s2335_s1 + $0x188] sm:$0xff]  ;;  %v1187_v7 = vpack.c.bf16 %v39_v4, %v38_v2  ;;  %v40_v14 = vld [vmem:[%s2335_s1 + $0x10] sm:$0xff]  ;;  %v1189_v16 = vpack.c.bf16 %v57_v13, %v56_v11 }
   0x4   :  { %v1217_v8 = vpack.c.bf16 %v87_v6, %v86_v5  ;;  %v70_v9 = vld [vmem:[%s2335_s1 + $0x100] sm:$0xff]  ;;  %v71_v10 = vld [vmem:[%s2335_s1 + $0x108] sm:$0xff]  ;;  %1186 = vmatprep.subr.bf16.mxu0 %v1185_v3  ;;  %v41_v15 = vld [vmem:[%s2335_s1 + $0x18] sm:$0xff] }
   0x5   :  { %v1219_v12 = vpack.c.bf16 %v71_v10, %v70_v9  ;;  %1188 = vmatpush3.bf16.msra.mxu0 %v1187_v7  ;;  %v1191_v17 = vpack.c.bf16 %v41_v15, %v40_v14  ;;  %v88_v18 = vld [vmem:[%s2335_s1 + $0x190] sm:$0xff]  ;;  %v89_v19 = vld [vmem:[%s2335_s1 + $0x198] sm:$0xff]  ;;  %v58_v23 = vld [vmem:[%s2335_s1 + $0xa0] sm:$0xff] }
   0x6   :  { %1218 = vmatprep.subr.bf16.mxu1 %v1217_v8  ;;  %v72_v20 = vld [vmem:[%s2335_s1 + $0x110] sm:$0xff]  ;;  %v1221_v21 = vpack.c.bf16 %v89_v19, %v88_v18  ;;  %v73_v22 = vld [vmem:[%s2335_s1 + $0x118] sm:$0xff]  ;;  %v59_v24 = vld [vmem:[%s2335_s1 + $0xa8] sm:$0xff]  ;;  %1190 = vmatprep.subr.bf16.mxu0 %v1189_v16 }
   0x7   :  { %1220 = vmatpush3.bf16.msra.mxu1 %v1219_v12  ;;  %v1223_v25 = vpack.c.bf16 %v73_v22, %v72_v20  ;;  %v1193_v26 = vpack.c.bf16 %v59_v24, %v58_v23  ;;  %v42_v27 = vld [vmem:[%s2335_s1 + $0x20] sm:$0xff]  ;;  %v43_v28 = vld [vmem:[%s2335_s1 + $0x28] sm:$0xff]  ;;  %v60_v35 = vld [vmem:[%s2335_s1 + $0xb0] sm:$0xff] }
   0x8   :  { %v90_v29 = vld [vmem:[%s2335_s1 + $0x1a0] sm:$0xff]  ;;  %1222 = vmatprep.subr.bf16.mxu1 %v1221_v21  ;;  %v91_v30 = vld [vmem:[%s2335_s1 + $0x1a8] sm:$0xff]  ;;  %v1195_v33 = vpack.c.bf16 %v43_v28, %v42_v27  ;;  %v61_v36 = vld [vmem:[%s2335_s1 + $0xb8] sm:$0xff] }
   0x9   :  { %v74_v31 = vld [vmem:[%s2335_s1 + $0x120] sm:$0xff]  ;;  %v75_v32 = vld [vmem:[%s2335_s1 + $0x128] sm:$0xff]  ;;  %1192 = vmatpush3.bf16.msra.mxu0 %v1191_v17  ;;  %v1225_v34 = vpack.c.bf16 %v91_v30, %v90_v29  ;;  %v44_v37 = vld [vmem:[%s2335_s1 + $0x30] sm:$0xff]  ;;  %v1197_v39 = vpack.c.bf16 %v61_v36, %v60_v35 }
   0xa   :  { %1194 = vmatprep.subr.bf16.mxu0 %v1193_v26  ;;  %v1227_v38 = vpack.c.bf16 %v75_v32, %v74_v31  ;;  %v45_v40 = vld [vmem:[%s2335_s1 + $0x38] sm:$0xff]  ;;  %v92_v41 = vld [vmem:[%s2335_s1 + $0x1b0] sm:$0xff]  ;;  %v62_v46 = vld [vmem:[%s2335_s1 + $0xc0] sm:$0xff] }
   0xb   :  { %1224 = vmatpush3.bf16.msra.mxu1 %v1223_v25  ;;  %v93_v42 = vld [vmem:[%s2335_s1 + $0x1b8] sm:$0xff]  ;;  %v76_v44 = vld [vmem:[%s2335_s1 + $0x130] sm:$0xff]  ;;  %v63_v47 = vld [vmem:[%s2335_s1 + $0xc8] sm:$0xff]  ;;  %v1199_v48 = vpack.c.bf16 %v45_v40, %v44_v37 }
   0xc   :  { %1226 = vmatprep.subr.bf16.mxu1 %v1225_v34  ;;  %v1229_v43 = vpack.c.bf16 %v93_v42, %v92_v41  ;;  %v77_v45 = vld [vmem:[%s2335_s1 + $0x138] sm:$0xff]  ;;  %v94_v49 = vld [vmem:[%s2335_s1 + $0x1c0] sm:$0xff]  ;;  %v95_v50 = vld [vmem:[%s2335_s1 + $0x1c8] sm:$0xff]  ;;  %v1201_v52 = vpack.c.bf16 %v63_v47, %v62_v46 }
   0xd   :  { %1196 = vmatpush3.bf16.msra.mxu0 %v1195_v33  ;;  %v1231_v51 = vpack.c.bf16 %v77_v45, %v76_v44  ;;  %v46_v53 = vld [vmem:[%s2335_s1 + $0x40] sm:$0xff]  ;;  %v47_v54 = vld [vmem:[%s2335_s1 + $0x48] sm:$0xff]  ;;  %v1233_v56 = vpack.c.bf16 %v95_v50, %v94_v49  ;;  %v64_v58 = vld [vmem:[%s2335_s1 + $0xd0] sm:$0xff] }
   0xe   :  { %1198 = vmatprep.subr.bf16.mxu0 %v1197_v39  ;;  %v78_v55 = vld [vmem:[%s2335_s1 + $0x140] sm:$0xff]  ;;  %v79_v57 = vld [vmem:[%s2335_s1 + $0x148] sm:$0xff]  ;;  %v65_v59 = vld [vmem:[%s2335_s1 + $0xd8] sm:$0xff]  ;;  %v1203_v62 = vpack.c.bf16 %v47_v54, %v46_v53 }
   0xf   :  { %1228 = vmatpush3.bf16.msra.mxu1 %v1227_v38  ;;  %v96_v60 = vld [vmem:[%s2335_s1 + $0x1d0] sm:$0xff]  ;;  %v97_v61 = vld [vmem:[%s2335_s1 + $0x1d8] sm:$0xff]  ;;  %v1235_v63 = vpack.c.bf16 %v79_v57, %v78_v55  ;;  %v1205_v0 = vpack.c.bf16 %v65_v59, %v64_v58  ;;  %v66_v6 = vld [vmem:[%s2335_s1 + $0xe0] sm:$0xff] }
  0x10   :  { %1230 = vmatprep.subr.bf16.mxu1 %v1229_v43  ;;  %v48_v1 = vld [vmem:[%s2335_s1 + $0x50] sm:$0xff]  ;;  %v49_v2 = vld [vmem:[%s2335_s1 + $0x58] sm:$0xff]  ;;  %v1237_v4 = vpack.c.bf16 %v97_v61, %v96_v60  ;;  %v67_v7 = vld [vmem:[%s2335_s1 + $0xe8] sm:$0xff] }
  0x11   :  { %1200 = vmatpush3.bf16.msra.mxu0 %v1199_v48  ;;  %v80_v3 = vld [vmem:[%s2335_s1 + $0x150] sm:$0xff]  ;;  %v81_v5 = vld [vmem:[%s2335_s1 + $0x158] sm:$0xff]  ;;  %v98_v8 = vld [vmem:[%s2335_s1 + $0x1e0] sm:$0xff]  ;;  %v1207_v10 = vpack.c.bf16 %v49_v2, %v48_v1  ;;  %v1209_v14 = vpack.c.bf16 %v67_v7, %v66_v6 }
  0x12   :  { %1202 = vmatprep.subr.bf16.mxu0 %v1201_v52  ;;  %v99_v9 = vld [vmem:[%s2335_s1 + $0x1e8] sm:$0xff]  ;;  %v50_v11 = vld [vmem:[%s2335_s1 + $0x60] sm:$0xff]  ;;  %v1239_v13 = vpack.c.bf16 %v81_v5, %v80_v3  ;;  %v68_v19 = vld [vmem:[%s2335_s1 + $0xf0] sm:$0xff] }
  0x13   :  { %1232 = vmatpush3.bf16.msra.mxu1 %v1231_v51  ;;  %v51_v12 = vld [vmem:[%s2335_s1 + $0x68] sm:$0xff]  ;;  %v82_v15 = vld [vmem:[%s2335_s1 + $0x160] sm:$0xff]  ;;  %v1241_v18 = vpack.c.bf16 %v99_v9, %v98_v8  ;;  %v69_v20 = vld [vmem:[%s2335_s1 + $0xf8] sm:$0xff] }
  0x14   :  { %1234 = vmatprep.subr.bf16.mxu1 %v1233_v56  ;;  %v83_v16 = vld [vmem:[%s2335_s1 + $0x168] sm:$0xff]  ;;  %v25_v21 = vld [vmem:[%s2334_s0 + $0x18] sm:$0xff]  ;;  %v100_v22 = vld [vmem:[%s2335_s1 + $0x1f0] sm:$0xff]  ;;  %v1211_v24 = vpack.c.bf16 %v51_v12, %v50_v11  ;;  %v1213_v26 = vpack.c.bf16 %v69_v20, %v68_v19 }
  0x15   :  { %1204 = vmatpush3.bf16.msra.mxu0 %v1203_v62  ;;  %v23_v17 = vld [vmem:[%s2334_s0 + $0x8] sm:$0xff]  ;;  %v101_v23 = vld [vmem:[%s2335_s1 + $0x1f8] sm:$0xff]  ;;  %435 = vmatprep.mubr.f32.mxu1 %v25_v21  ;;  %v1243_v25 = vpack.c.bf16 %v83_v16, %v82_v15  ;;  %v52_v27 = vld [vmem:[%s2335_s1 + $0x70] sm:$0xff] }
  0x16   :  { %1206 = vmatprep.subr.bf16.mxu0 %v1205_v0  ;;  %365 = vmatprep.mubr.f32.mxu0 %v23_v17  ;;  %v53_v28 = vld [vmem:[%s2335_s1 + $0x78] sm:$0xff]  ;;  %v84_v29 = vld [vmem:[%s2335_s1 + $0x170] sm:$0xff]  ;;  %v1245_v30 = vpack.c.bf16 %v101_v23, %v100_v22  ;;  %v118_v32 = vld [vmem:[%s2335_s1 + $0x280] sm:$0xff] }
  0x17   :  { %1236 = vmatpush3.bf16.msra.mxu1 %v1235_v63  ;;  %v85_v31 = vld [vmem:[%s2335_s1 + $0x178] sm:$0xff]  ;;  %v119_v33 = vld [vmem:[%s2335_s1 + $0x288] sm:$0xff]  ;;  %v150_v34 = vld [vmem:[%s2335_s1 + $0x380] sm:$0xff]  ;;  %v1215_v36 = vpack.c.bf16 %v53_v28, %v52_v27 }
  0x18   :  { %1238 = vmatprep.subr.bf16.mxu1 %v1237_v4  ;;  %v151_v35 = vld [vmem:[%s2335_s1 + $0x388] sm:$0xff]  ;;  %v1247_v37 = vpack.c.bf16 %v85_v31, %v84_v29  ;;  %v1249_v38 = vpack.c.bf16 %v119_v33, %v118_v32  ;;  %v102_v39 = vld [vmem:[%s2335_s1 + $0x200] sm:$0xff]  ;;  %v120_v44 = vld [vmem:[%s2335_s1 + $0x290] sm:$0xff] }
  0x19   :  { %1208 = vmatpush3.bf16.msra.mxu0 %v1207_v10  ;;  %v103_v40 = vld [vmem:[%s2335_s1 + $0x208] sm:$0xff]  ;;  %v134_v41 = vld [vmem:[%s2335_s1 + $0x300] sm:$0xff]  ;;  %v1281_v42 = vpack.c.bf16 %v151_v35, %v150_v34  ;;  %v121_v45 = vld [vmem:[%s2335_s1 + $0x298] sm:$0xff] }
  0x1a   :  { %1210 = vmatprep.subr.bf16.mxu0 %v1209_v14  ;;  %v135_v43 = vld [vmem:[%s2335_s1 + $0x308] sm:$0xff]  ;;  %v152_v46 = vld [vmem:[%s2335_s1 + $0x390] sm:$0xff]  ;;  %v153_v47 = vld [vmem:[%s2335_s1 + $0x398] sm:$0xff]  ;;  %v1251_v49 = vpack.c.bf16 %v103_v40, %v102_v39  ;;  %v1253_v52 = vpack.c.bf16 %v121_v45, %v120_v44 }
  0x1b   :  { %1240 = vmatpush3.bf16.msra.mxu1 %v1239_v13  ;;  %v22_v48 = vld [vmem:[%s2334_s0] sm:$0xff]  ;;  %v24_v50 = vld [vmem:[%s2334_s0 + $0x10] sm:$0xff]  ;;  %v1283_v51 = vpack.c.bf16 %v135_v43, %v134_v41  ;;  %v105_v54 = vld [vmem:[%s2335_s1 + $0x218] sm:$0xff]  ;;  %v1285_v56 = vpack.c.bf16 %v153_v47, %v152_v46 }
  0x1c   :  { %1242 = vmatprep.subr.bf16.mxu1 %v1241_v18  ;;  %v104_v53 = vld [vmem:[%s2335_s1 + $0x210] sm:$0xff]  ;;  %v137_v57 = vld [vmem:[%s2335_s1 + $0x318] sm:$0xff]  ;;  %v122_v58 = vld [vmem:[%s2335_s1 + $0x2a0] sm:$0xff] }
  0x1d   :  { %1212 = vmatpush3.bf16.msra.mxu0 %v1211_v24  ;;  %v136_v55 = vld [vmem:[%s2335_s1 + $0x310] sm:$0xff]  ;;  %v123_v59 = vld [vmem:[%s2335_s1 + $0x2a8] sm:$0xff]  ;;  %v154_v60 = vld [vmem:[%s2335_s1 + $0x3a0] sm:$0xff]  ;;  %v1255_v62 = vpack.c.bf16 %v105_v54, %v104_v53 }
  0x1e   :  { %1214 = vmatprep.subr.bf16.mxu0 %v1213_v26  ;;  %v155_v61 = vld [vmem:[%s2335_s1 + $0x3a8] sm:$0xff]  ;;  %v1287_v63 = vpack.c.bf16 %v137_v57, %v136_v55  ;;  %v1257_v0 = vpack.c.bf16 %v123_v59, %v122_v58  ;;  %v106_v1 = vld [vmem:[%s2335_s1 + $0x220] sm:$0xff]  ;;  %v124_v6 = vld [vmem:[%s2335_s1 + $0x2b0] sm:$0xff] }
  0x1f   :  { %1244 = vmatpush3.bf16.msra.mxu1 %v1243_v25  ;;  %v107_v2 = vld [vmem:[%s2335_s1 + $0x228] sm:$0xff]  ;;  %v138_v3 = vld [vmem:[%s2335_s1 + $0x320] sm:$0xff]  ;;  %v1289_v4 = vpack.c.bf16 %v155_v61, %v154_v60  ;;  %v125_v7 = vld [vmem:[%s2335_s1 + $0x2b8] sm:$0xff] }
  0x20   :  { %1246 = vmatprep.subr.bf16.mxu1 %v1245_v30  ;;  %v139_v5 = vld [vmem:[%s2335_s1 + $0x328] sm:$0xff]  ;;  %v156_v8 = vld [vmem:[%s2335_s1 + $0x3b0] sm:$0xff]  ;;  %v157_v9 = vld [vmem:[%s2335_s1 + $0x3b8] sm:$0xff]  ;;  %v1259_v10 = vpack.c.bf16 %v107_v2, %v106_v1  ;;  %v1261_v12 = vpack.c.bf16 %v125_v7, %v124_v6 }
  0x21   :  { %1216 = vmatpush3.bf16.msra.mxu0 %v1215_v36  ;;  %v1291_v11 = vpack.c.bf16 %v139_v5, %v138_v3  ;;  %v108_v13 = vld [vmem:[%s2335_s1 + $0x230] sm:$0xff]  ;;  %v109_v14 = vld [vmem:[%s2335_s1 + $0x238] sm:$0xff]  ;;  %v1293_v16 = vpack.c.bf16 %v157_v9, %v156_v8  ;;  %v126_v18 = vld [vmem:[%s2335_s1 + $0x2c0] sm:$0xff] }
  0x22   :  { %1250 = vmatprep.subr.bf16.mxu0 %v1249_v38  ;;  %v140_v15 = vld [vmem:[%s2335_s1 + $0x330] sm:$0xff]  ;;  %v141_v17 = vld [vmem:[%s2335_s1 + $0x338] sm:$0xff]  ;;  %v127_v19 = vld [vmem:[%s2335_s1 + $0x2c8] sm:$0xff]  ;;  %v1263_v22 = vpack.c.bf16 %v109_v14, %v108_v13 }
  0x23   :  { %1248 = vmatpush3.bf16.msra.mxu1 %v1247_v37  ;;  %v158_v20 = vld [vmem:[%s2335_s1 + $0x3c0] sm:$0xff]  ;;  %v159_v21 = vld [vmem:[%s2335_s1 + $0x3c8] sm:$0xff]  ;;  %v1295_v25 = vpack.c.bf16 %v141_v17, %v140_v15  ;;  %v1265_v26 = vpack.c.bf16 %v127_v19, %v126_v18  ;;  %v29_v29 = vld [vmem:[%s2334_s0 + $0x38] sm:$0xff] }
  0x24   :  { %1282 = vmatprep.subr.bf16.mxu1 %v1281_v42  ;;  %366 = vmatmul.mubr.f32.vlgmr.msra.gmra.mrb[0].mxu0 %v22_v48  ;;  %v110_v23 = vld [vmem:[%s2335_s1 + $0x240] sm:$0xff]  ;;  %v27_v24 = vld [vmem:[%s2334_s0 + $0x28] sm:$0xff]  ;;  %v1297_v30 = vpack.c.bf16 %v159_v21, %v158_v20  ;;  %v128_v32 = vld [vmem:[%s2335_s1 + $0x2d0] sm:$0xff] }
  0x25   :  { %1252 = vmatpush3.bf16.msra.mxu0 %v1251_v49  ;;  %v111_v27 = vld [vmem:[%s2335_s1 + $0x248] sm:$0xff]  ;;  %v142_v28 = vld [vmem:[%s2335_s1 + $0x340] sm:$0xff]  ;;  %v129_v33 = vld [vmem:[%s2335_s1 + $0x2d8] sm:$0xff]  ;;  %505 = vmatprep.mubr.f32.mxu0 %v27_v24 }
  0x26   :  { %436 = vmatmul.mubr.f32.vlgmr.msra.gmra.mrb[0].mxu1 %v24_v50  ;;  %1254 = vmatprep.subr.bf16.mxu0 %v1253_v52  ;;  %v143_v31 = vld [vmem:[%s2335_s1 + $0x348] sm:$0xff]  ;;  %v160_v34 = vld [vmem:[%s2335_s1 + $0x3d0] sm:$0xff]  ;;  %v161_v35 = vld [vmem:[%s2335_s1 + $0x3d8] sm:$0xff]  ;;  %v1267_v36 = vpack.c.bf16 %v111_v27, %v110_v23  ;;  %v1269_v38 = vpack.c.bf16 %v129_v33, %v128_v32 }
  0x27   :  { %1284 = vmatpush3.bf16.msra.mxu1 %v1283_v51  ;;  %575 = vmatprep.mubr.f32.mxu1 %v29_v29  ;;  %v1299_v37 = vpack.c.bf16 %v143_v31, %v142_v28  ;;  %v112_v39 = vld [vmem:[%s2335_s1 + $0x250] sm:$0xff]  ;;  %v113_v40 = vld [vmem:[%s2335_s1 + $0x258] sm:$0xff]  ;;  %v1301_v42 = vpack.c.bf16 %v161_v35, %v160_v34  ;;  %v130_v44 = vld [vmem:[%s2335_s1 + $0x2e0] sm:$0xff] }
  0x28   :  { %1286 = vmatprep.subr.bf16.mxu1 %v1285_v56  ;;  %v144_v41 = vld [vmem:[%s2335_s1 + $0x350] sm:$0xff]  ;;  %v145_v43 = vld [vmem:[%s2335_s1 + $0x358] sm:$0xff]  ;;  %v131_v45 = vld [vmem:[%s2335_s1 + $0x2e8] sm:$0xff]  ;;  %v1271_v48 = vpack.c.bf16 %v113_v40, %v112_v39 }
  0x29   :  { %1256 = vmatpush3.bf16.msra.mxu0 %v1255_v62  ;;  %v162_v46 = vld [vmem:[%s2335_s1 + $0x3e0] sm:$0xff]  ;;  %v163_v47 = vld [vmem:[%s2335_s1 + $0x3e8] sm:$0xff]  ;;  %v1303_v49 = vpack.c.bf16 %v145_v43, %v144_v41  ;;  %v1273_v50 = vpack.c.bf16 %v131_v45, %v130_v44  ;;  %v132_v56 = vld [vmem:[%s2335_s1 + $0x2f0] sm:$0xff] }
  0x2a   :  { %1258 = vmatprep.subr.bf16.mxu0 %v1257_v0  ;;  %v114_v51 = vld [vmem:[%s2335_s1 + $0x260] sm:$0xff]  ;;  %v115_v52 = vld [vmem:[%s2335_s1 + $0x268] sm:$0xff]  ;;  %v1305_v54 = vpack.c.bf16 %v163_v47, %v162_v46  ;;  %v133_v57 = vld [vmem:[%s2335_s1 + $0x2f8] sm:$0xff] }
  0x2b   :  { %1288 = vmatpush3.bf16.msra.mxu1 %v1287_v63  ;;  %v146_v53 = vld [vmem:[%s2335_s1 + $0x360] sm:$0xff]  ;;  %v147_v55 = vld [vmem:[%s2335_s1 + $0x368] sm:$0xff]  ;;  %v164_v58 = vld [vmem:[%s2335_s1 + $0x3f0] sm:$0xff]  ;;  %v1275_v60 = vpack.c.bf16 %v115_v52, %v114_v51  ;;  %v1277_v62 = vpack.c.bf16 %v133_v57, %v132_v56 }
  0x2c   :  { %1290 = vmatprep.subr.bf16.mxu1 %v1289_v4  ;;  %v165_v59 = vld [vmem:[%s2335_s1 + $0x3f8] sm:$0xff]  ;;  %v1307_v61 = vpack.c.bf16 %v147_v55, %v146_v53  ;;  %v116_v63 = vld [vmem:[%s2335_s1 + $0x270] sm:$0xff]  ;;  %v182_v4 = vld [vmem:[%s2335_s1 + $0x480] sm:$0xff] }
  0x2d   :  { %1260 = vmatpush3.bf16.msra.mxu0 %v1259_v10  ;;  %v117_v0 = vld [vmem:[%s2335_s1 + $0x278] sm:$0xff]  ;;  %v148_v1 = vld [vmem:[%s2335_s1 + $0x370] sm:$0xff]  ;;  %v1309_v2 = vpack.c.bf16 %v165_v59, %v164_v58  ;;  %v183_v5 = vld [vmem:[%s2335_s1 + $0x488] sm:$0xff] }
  0x2e   :  { %1262 = vmatprep.subr.bf16.mxu0 %v1261_v12  ;;  %v149_v3 = vld [vmem:[%s2335_s1 + $0x378] sm:$0xff]  ;;  %v214_v6 = vld [vmem:[%s2335_s1 + $0x580] sm:$0xff]  ;;  %v215_v7 = vld [vmem:[%s2335_s1 + $0x588] sm:$0xff]  ;;  %v1279_v8 = vpack.c.bf16 %v117_v0, %v116_v63  ;;  %v1313_v10 = vpack.c.bf16 %v183_v5, %v182_v4 }
  0x2f   :  { %1292 = vmatpush3.bf16.msra.mxu1 %v1291_v11  ;;  %v1311_v9 = vpack.c.bf16 %v149_v3, %v148_v1  ;;  %v166_v11 = vld [vmem:[%s2335_s1 + $0x400] sm:$0xff]  ;;  %v167_v12 = vld [vmem:[%s2335_s1 + $0x408] sm:$0xff]  ;;  %v1345_v14 = vpack.c.bf16 %v215_v7, %v214_v6  ;;  %v185_v17 = vld [vmem:[%s2335_s1 + $0x498] sm:$0xff] }
  0x30   :  { %1294 = vmatprep.subr.bf16.mxu1 %v1293_v16  ;;  %v198_v13 = vld [vmem:[%s2335_s1 + $0x500] sm:$0xff]  ;;  %v199_v15 = vld [vmem:[%s2335_s1 + $0x508] sm:$0xff]  ;;  %v184_v16 = vld [vmem:[%s2335_s1 + $0x490] sm:$0xff]  ;;  %v1315_v21 = vpack.c.bf16 %v167_v12, %v166_v11 }
  0x31   :  { %1264 = vmatpush3.bf16.msra.mxu0 %v1263_v22  ;;  %v216_v18 = vld [vmem:[%s2335_s1 + $0x590] sm:$0xff]  ;;  %v217_v19 = vld [vmem:[%s2335_s1 + $0x598] sm:$0xff]  ;;  %v26_v20 = vld [vmem:[%s2334_s0 + $0x20] sm:$0xff]  ;;  %v1347_v23 = vpack.c.bf16 %v199_v15, %v198_v13  ;;  %v1317_v24 = vpack.c.bf16 %v185_v17, %v184_v16 }
  0x32   :  { %1266 = vmatprep.subr.bf16.mxu0 %v1265_v26  ;;  %v28_v22 = vld [vmem:[%s2334_s0 + $0x30] sm:$0xff]  ;;  %v169_v26 = vld [vmem:[%s2335_s1 + $0x418] sm:$0xff]  ;;  %v1349_v28 = vpack.c.bf16 %v217_v19, %v216_v18  ;;  %v187_v31 = vld [vmem:[%s2335_s1 + $0x4a8] sm:$0xff] }
  0x33   :  { %1296 = vmatpush3.bf16.msra.mxu1 %v1295_v25  ;;  %v168_v25 = vld [vmem:[%s2335_s1 + $0x410] sm:$0xff]  ;;  %v201_v29 = vld [vmem:[%s2335_s1 + $0x518] sm:$0xff]  ;;  %v218_v32 = vld [vmem:[%s2335_s1 + $0x5a0] sm:$0xff] }
  0x34   :  { %1298 = vmatprep.subr.bf16.mxu1 %v1297_v30  ;;  %v200_v27 = vld [vmem:[%s2335_s1 + $0x510] sm:$0xff]  ;;  %v186_v30 = vld [vmem:[%s2335_s1 + $0x4a0] sm:$0xff]  ;;  %v219_v33 = vld [vmem:[%s2335_s1 + $0x5a8] sm:$0xff]  ;;  %v1319_v35 = vpack.c.bf16 %v169_v26, %v168_v25 }
  0x35   :  { %1268 = vmatpush3.bf16.msra.mxu0 %v1267_v36  ;;  %v31_v34 = vld [vmem:[%s2334_s0 + $0x48] sm:$0xff]  ;;  %v33_v36 = vld [vmem:[%s2334_s0 + $0x58] sm:$0xff]  ;;  %v170_v39 = vld [vmem:[%s2335_s1 + $0x420] sm:$0xff] }
  0x36   :  { %1270 = vmatprep.subr.bf16.mxu0 %v1269_v38  ;;  %v1321_v38 = vpack.c.bf16 %v187_v31, %v186_v30  ;;  %v171_v40 = vld [vmem:[%s2335_s1 + $0x428] sm:$0xff]  ;;  %v202_v41 = vld [vmem:[%s2335_s1 + $0x520] sm:$0xff]  ;;  %v188_v44 = vld [vmem:[%s2335_s1 + $0x4b0] sm:$0xff] }
  0x37   :  { %1300 = vmatpush3.bf16.msra.mxu1 %v1299_v37  ;;  %v1351_v37 = vpack.c.bf16 %v201_v29, %v200_v27  ;;  %v203_v43 = vld [vmem:[%s2335_s1 + $0x528] sm:$0xff]  ;;  %v189_v45 = vld [vmem:[%s2335_s1 + $0x4b8] sm:$0xff]  ;;  %v220_v46 = vld [vmem:[%s2335_s1 + $0x5b0] sm:$0xff] }
  0x38   :  { %1302 = vmatprep.subr.bf16.mxu1 %v1301_v42  ;;  %v1353_v42 = vpack.c.bf16 %v219_v33, %v218_v32  ;;  %v221_v47 = vld [vmem:[%s2335_s1 + $0x5b8] sm:$0xff]  ;;  %v172_v51 = vld [vmem:[%s2335_s1 + $0x430] sm:$0xff]  ;;  %v190_v56 = vld [vmem:[%s2335_s1 + $0x4c0] sm:$0xff] }
  0x39   :  { %1272 = vmatpush3.bf16.msra.mxu0 %v1271_v48  ;;  %v1323_v48 = vpack.c.bf16 %v171_v40, %v170_v39  ;;  %v173_v52 = vld [vmem:[%s2335_s1 + $0x438] sm:$0xff]  ;;  %v204_v53 = vld [vmem:[%s2335_s1 + $0x530] sm:$0xff]  ;;  %v191_v57 = vld [vmem:[%s2335_s1 + $0x4c8] sm:$0xff] }
  0x3a   :  { %1274 = vmatprep.subr.bf16.mxu0 %v1273_v50  ;;  %v1325_v50 = vpack.c.bf16 %v189_v45, %v188_v44  ;;  %v205_v55 = vld [vmem:[%s2335_s1 + $0x538] sm:$0xff]  ;;  %v222_v58 = vld [vmem:[%s2335_s1 + $0x5c0] sm:$0xff]  ;;  %v223_v59 = vld [vmem:[%s2335_s1 + $0x5c8] sm:$0xff] }
  0x3b   :  { %1304 = vmatpush3.bf16.msra.mxu1 %v1303_v49  ;;  %v1355_v49 = vpack.c.bf16 %v203_v43, %v202_v41  ;;  %v174_v63 = vld [vmem:[%s2335_s1 + $0x440] sm:$0xff]  ;;  %v175_v0 = vld [vmem:[%s2335_s1 + $0x448] sm:$0xff]  ;;  %v192_v4 = vld [vmem:[%s2335_s1 + $0x4d0] sm:$0xff] }
  0x3c   :  { %1306 = vmatprep.subr.bf16.mxu1 %v1305_v54  ;;  %v1357_v54 = vpack.c.bf16 %v221_v47, %v220_v46  ;;  %v206_v1 = vld [vmem:[%s2335_s1 + $0x540] sm:$0xff]  ;;  %v207_v3 = vld [vmem:[%s2335_s1 + $0x548] sm:$0xff]  ;;  %v193_v5 = vld [vmem:[%s2335_s1 + $0x4d8] sm:$0xff] }
  0x3d   :  { %1276 = vmatpush3.bf16.msra.mxu0 %v1275_v60  ;;  %v1327_v60 = vpack.c.bf16 %v173_v52, %v172_v51  ;;  %v224_v6 = vld [vmem:[%s2335_s1 + $0x5d0] sm:$0xff]  ;;  %v225_v7 = vld [vmem:[%s2335_s1 + $0x5d8] sm:$0xff]  ;;  %v194_v16 = vld [vmem:[%s2335_s1 + $0x4e0] sm:$0xff] }
  0x3e   :  { %1278 = vmatprep.subr.bf16.mxu0 %v1277_v62  ;;  %v1329_v62 = vpack.c.bf16 %v191_v57, %v190_v56  ;;  %v176_v11 = vld [vmem:[%s2335_s1 + $0x450] sm:$0xff]  ;;  %v177_v12 = vld [vmem:[%s2335_s1 + $0x458] sm:$0xff]  ;;  %v195_v17 = vld [vmem:[%s2335_s1 + $0x4e8] sm:$0xff] }
  0x3f   :  { %1308 = vmatpush3.bf16.msra.mxu1 %v1307_v61  ;;  %v1359_v61 = vpack.c.bf16 %v205_v55, %v204_v53  ;;  %v208_v13 = vld [vmem:[%s2335_s1 + $0x550] sm:$0xff]  ;;  %v209_v15 = vld [vmem:[%s2335_s1 + $0x558] sm:$0xff]  ;;  %v226_v18 = vld [vmem:[%s2335_s1 + $0x5e0] sm:$0xff] }
  0x40   :  { %1310 = vmatprep.subr.bf16.mxu1 %v1309_v2  ;;  %v1361_v2 = vpack.c.bf16 %v223_v59, %v222_v58  ;;  %v227_v19 = vld [vmem:[%s2335_s1 + $0x5e8] sm:$0xff]  ;;  %v210_v25 = vld [vmem:[%s2335_s1 + $0x560] sm:$0xff]  ;;  %v197_v29 = vld [vmem:[%s2335_s1 + $0x4f8] sm:$0xff] }
  0x41   :  { %1280 = vmatpush3.bf16.msra.mxu0 %v1279_v8  ;;  %v1331_v8 = vpack.c.bf16 %v175_v0, %v174_v63  ;;  %v1369_v26 = vpack.c.bf16 %v227_v19, %v226_v18  ;;  %v211_v27 = vld [vmem:[%s2335_s1 + $0x568] sm:$0xff]  ;;  %v228_v30 = vld [vmem:[%s2335_s1 + $0x5f0] sm:$0xff]  ;;  %v229_v31 = vld [vmem:[%s2335_s1 + $0x5f8] sm:$0xff] }
  0x42   :  { %1314 = vmatprep.subr.bf16.mxu0 %v1313_v10  ;;  %v1333_v10 = vpack.c.bf16 %v193_v5, %v192_v4  ;;  %v180_v33 = vld [vmem:[%s2335_s1 + $0x470] sm:$0xff]  ;;  %v1373_v39 = vpack.c.bf16 %v229_v31, %v228_v30  ;;  %v246_v40 = vld [vmem:[%s2335_s1 + $0x680] sm:$0xff]  ;;  %v247_v41 = vld [vmem:[%s2335_s1 + $0x688] sm:$0xff] }
  0x43   :  { %1312 = vmatpush3.bf16.msra.mxu1 %v1311_v9  ;;  %v1363_v9 = vpack.c.bf16 %v207_v3, %v206_v1 }
  0x44   :  { %1346 = vmatprep.subr.bf16.mxu1 %v1345_v14  ;;  %506 = vmatmul.mubr.f32.vlgmr.msra.gmra.mrb[2].mxu0 %v26_v20  ;;  %v1365_v14 = vpack.c.bf16 %v225_v7, %v224_v6  ;;  %v1335_v20 = vpack.c.bf16 %v177_v12, %v176_v11 }
  0x45   :  { %1316 = vmatpush3.bf16.msra.mxu0 %v1315_v21  ;;  %645 = vmatprep.mubr.f32.mxu0 %v31_v34  ;;  %v1367_v21 = vpack.c.bf16 %v209_v15, %v208_v13  ;;  %v1371_v34 = vpack.c.bf16 %v211_v27, %v210_v25 }
  0x46   :  { %576 = vmatmul.mubr.f32.vlgmr.msra.gmra.mrb[2].mxu1 %v28_v22  ;;  %1318 = vmatprep.subr.bf16.mxu0 %v1317_v24  ;;  %v1337_v22 = vpack.c.bf16 %v195_v17, %v194_v16  ;;  %v179_v24 = vld [vmem:[%s2335_s1 + $0x468] sm:$0xff] }
  0x47   :  { %1348 = vmatpush3.bf16.msra.mxu1 %v1347_v23  ;;  %715 = vmatprep.mubr.f32.mxu1 %v33_v36  ;;  %v178_v23 = vld [vmem:[%s2335_s1 + $0x460] sm:$0xff]  ;;  %v181_v36 = vld [vmem:[%s2335_s1 + $0x478] sm:$0xff] }
  0x48   :  { %1350 = vmatprep.subr.bf16.mxu1 %v1349_v28  ;;  %v196_v28 = vld [vmem:[%s2335_s1 + $0x4f0] sm:$0xff]  ;;  %v1339_v32 = vpack.c.bf16 %v179_v24, %v178_v23 }
  0x49   :  { %1320 = vmatpush3.bf16.msra.mxu0 %v1319_v35  ;;  %v1341_v35 = vpack.c.bf16 %v197_v29, %v196_v28 }
  0x4a   :  { %1322 = vmatprep.subr.bf16.mxu0 %v1321_v38  ;;  %v213_v38 = vld [vmem:[%s2335_s1 + $0x578] sm:$0xff] }
  0x4b   :  { %1352 = vmatpush3.bf16.msra.mxu1 %v1351_v37  ;;  %v212_v37 = vld [vmem:[%s2335_s1 + $0x570] sm:$0xff] }
  0x4c   :  { %1354 = vmatprep.subr.bf16.mxu1 %v1353_v42 }
  0x4d   :  { %1324 = vmatpush3.bf16.msra.mxu0 %v1323_v48 }
  0x4e   :  { %1326 = vmatprep.subr.bf16.mxu0 %v1325_v50 }
  0x4f   :  { %1356 = vmatpush3.bf16.msra.mxu1 %v1355_v49 }
  0x50   :  { %1358 = vmatprep.subr.bf16.mxu1 %v1357_v54 }
  0x51   :  { %1328 = vmatpush3.bf16.msra.mxu0 %v1327_v60 }
  0x52   :  { %1330 = vmatprep.subr.bf16.mxu0 %v1329_v62 }
  0x53   :  { %1360 = vmatpush3.bf16.msra.mxu1 %v1359_v61 }
  0x54   :  { %1362 = vmatprep.subr.bf16.mxu1 %v1361_v2 }
  0x55   :  { %1332 = vmatpush3.bf16.msra.mxu0 %v1331_v8 }
  0x56   :  { %1334 = vmatprep.subr.bf16.mxu0 %v1333_v10 }
  0x57   :  { %1364 = vmatpush3.bf16.msra.mxu1 %v1363_v9 }
  0x58   :  { %1366 = vmatprep.subr.bf16.mxu1 %v1365_v14 }
  0x59   :  { %1336 = vmatpush3.bf16.msra.mxu0 %v1335_v20 }
  0x5a   :  { %1338 = vmatprep.subr.bf16.mxu0 %v1337_v22 }
  0x5b   :  { %1368 = vmatpush3.bf16.msra.mxu1 %v1367_v21 }
  0x5c   :  { %1370 = vmatprep.subr.bf16.mxu1 %v1369_v26 }
  0x5d   :  { %11 = vsyncpa [#allocation4], 0  ;;  %v278_v42 = vld [vmem:[%s2335_s1 + $0x780] sm:$0xff]  ;;  %v279_v43 = vld [vmem:[%s2335_s1 + $0x788] sm:$0xff]  ;;  %1340 = vmatpush3.bf16.msra.mxu0 %v1339_v32  ;;  %v1343_v44 = vpack.c.bf16 %v181_v36, %v180_v33  ;;  %v1375_v45 = vpack.c.bf16 %v213_v38, %v212_v37  ;;  %v1377_v46 = vpack.c.bf16 %v247_v41, %v246_v40  ;;  %vm872_vm1 = vcmask 523264   ;;  %s1466_s15 = smov [#allocation3]  }
  0x5e   :  { %1342 = vmatprep.subr.bf16.mxu0 %v1341_v35  ;;  %v230_v47 = vld [vmem:[%s2335_s1 + $0x600] sm:$0xff]  ;;  %v231_v48 = vld [vmem:[%s2335_s1 + $0x608] sm:$0xff]  ;;  %v1409_v50 = vpack.c.bf16 %v279_v43, %v278_v42  ;;  %v248_v52 = vld [vmem:[%s2335_s1 + $0x690] sm:$0xff]  ;;  %s895_s16 = sshll.u32 %s1466_s15, 4  ;;  %vm887_vm2 = vcmask 57344   ;;  %s896_s16 = int_to_ptr.vmem [resolvable:$true] %s895_s16 }
  0x5f   :  { %1372 = vmatpush3.bf16.msra.mxu1 %v1371_v34  ;;  %v262_v49 = vld [vmem:[%s2335_s1 + $0x700] sm:$0xff]  ;;  %v263_v51 = vld [vmem:[%s2335_s1 + $0x708] sm:$0xff]  ;;  %v249_v53 = vld [vmem:[%s2335_s1 + $0x698] sm:$0xff]  ;;  %v1379_v57 = vpack.c.bf16 %v231_v48, %v230_v47  ;;  %s1446_s17 = scalar_lea.vmem %s896_s16, 32  ;;  %p1447_p1 = scmp.lt.s32.totalorder %s896_s16, %s896_s16 }
  0x60   :  { %1374 = vmatprep.subr.bf16.mxu1 %v1373_v39  ;;  %v280_v54 = vld [vmem:[%s2335_s1 + $0x790] sm:$0xff]  ;;  %v281_v55 = vld [vmem:[%s2335_s1 + $0x798] sm:$0xff]  ;;  %v30_v56 = vld [vmem:[%s2334_s0 + $0x40] sm:$0xff]  ;;  %v1411_v59 = vpack.c.bf16 %v263_v51, %v262_v49  ;;  %v1381_v60 = vpack.c.bf16 %v249_v53, %v248_v52 }
  0x61   :  { %1344 = vmatpush3.bf16.msra.mxu0 %v1343_v44  ;;  %v32_v58 = vld [vmem:[%s2334_s0 + $0x50] sm:$0xff]  ;;  %v233_v62 = vld [vmem:[%s2335_s1 + $0x618] sm:$0xff]  ;;  %v1413_v0 = vpack.c.bf16 %v281_v55, %v280_v54  ;;  %v250_v2 = vld [vmem:[%s2335_s1 + $0x6a0] sm:$0xff] }
  0x62   :  { %1378 = vmatprep.subr.bf16.mxu0 %v1377_v46  ;;  %v232_v61 = vld [vmem:[%s2335_s1 + $0x610] sm:$0xff]  ;;  %v265_v1 = vld [vmem:[%s2335_s1 + $0x718] sm:$0xff]  ;;  %v251_v3 = vld [vmem:[%s2335_s1 + $0x6a8] sm:$0xff] }
  0x63   :  { %1376 = vmatpush3.bf16.msra.mxu1 %v1375_v45  ;;  %v264_v63 = vld [vmem:[%s2335_s1 + $0x710] sm:$0xff]  ;;  %v282_v4 = vld [vmem:[%s2335_s1 + $0x7a0] sm:$0xff]  ;;  %v283_v5 = vld [vmem:[%s2335_s1 + $0x7a8] sm:$0xff]  ;;  %v1383_v7 = vpack.c.bf16 %v233_v62, %v232_v61  ;;  %v1385_v10 = vpack.c.bf16 %v251_v3, %v250_v2 }
  0x64   :  { %1410 = vmatprep.subr.bf16.mxu1 %v1409_v50  ;;  %646 = vmatmul.mubr.f32.vlgmr.msra.gmra.mrb[4].mxu0 %v30_v56  ;;  %v35_v6 = vld [vmem:[%s2334_s0 + $0x68] sm:$0xff]  ;;  %v37_v8 = vld [vmem:[%s2334_s0 + $0x78] sm:$0xff]  ;;  %v1415_v9 = vpack.c.bf16 %v265_v1, %v264_v63  ;;  %v234_v11 = vld [vmem:[%s2335_s1 + $0x620] sm:$0xff]  ;;  %v1417_v14 = vpack.c.bf16 %v283_v5, %v282_v4 }
  0x65   :  { %1380 = vmatpush3.bf16.msra.mxu0 %v1379_v57  ;;  %v235_v12 = vld [vmem:[%s2335_s1 + $0x628] sm:$0xff]  ;;  %v266_v13 = vld [vmem:[%s2335_s1 + $0x720] sm:$0xff]  ;;  %v252_v16 = vld [vmem:[%s2335_s1 + $0x6b0] sm:$0xff]  ;;  %785 = vmatprep.mubr.f32.mxu0 %v35_v6 }
  0x66   :  { %716 = vmatmul.mubr.f32.vlgmr.msra.gmra.mrb[4].mxu1 %v32_v58  ;;  %1382 = vmatprep.subr.bf16.mxu0 %v1381_v60  ;;  %v267_v15 = vld [vmem:[%s2335_s1 + $0x728] sm:$0xff]  ;;  %v253_v17 = vld [vmem:[%s2335_s1 + $0x6b8] sm:$0xff]  ;;  %v284_v18 = vld [vmem:[%s2335_s1 + $0x7b0] sm:$0xff]  ;;  %v1387_v20 = vpack.c.bf16 %v235_v12, %v234_v11 }
  0x67   :  { %1412 = vmatpush3.bf16.msra.mxu1 %v1411_v59  ;;  %v285_v19 = vld [vmem:[%s2335_s1 + $0x7b8] sm:$0xff]  ;;  %855 = vmatprep.mubr.f32.mxu1 %v37_v8  ;;  %v1419_v21 = vpack.c.bf16 %v267_v15, %v266_v13  ;;  %v1389_v22 = vpack.c.bf16 %v253_v17, %v252_v16  ;;  %v236_v23 = vld [vmem:[%s2335_s1 + $0x630] sm:$0xff]  ;;  %v254_v28 = vld [vmem:[%s2335_s1 + $0x6c0] sm:$0xff] }
  0x68   :  { %1414 = vmatprep.subr.bf16.mxu1 %v1413_v0  ;;  %v237_v24 = vld [vmem:[%s2335_s1 + $0x638] sm:$0xff]  ;;  %v268_v25 = vld [vmem:[%s2335_s1 + $0x730] sm:$0xff]  ;;  %v1421_v26 = vpack.c.bf16 %v285_v19, %v284_v18  ;;  %v255_v29 = vld [vmem:[%s2335_s1 + $0x6c8] sm:$0xff] }
  0x69   :  { %1384 = vmatpush3.bf16.msra.mxu0 %v1383_v7  ;;  %v269_v27 = vld [vmem:[%s2335_s1 + $0x738] sm:$0xff]  ;;  %v286_v30 = vld [vmem:[%s2335_s1 + $0x7c0] sm:$0xff]  ;;  %v287_v31 = vld [vmem:[%s2335_s1 + $0x7c8] sm:$0xff]  ;;  %v1391_v32 = vpack.c.bf16 %v237_v24, %v236_v23  ;;  %v1393_v34 = vpack.c.bf16 %v255_v29, %v254_v28 }
  0x6a   :  { %1386 = vmatprep.subr.bf16.mxu0 %v1385_v10  ;;  %v1423_v33 = vpack.c.bf16 %v269_v27, %v268_v25  ;;  %v238_v35 = vld [vmem:[%s2335_s1 + $0x640] sm:$0xff]  ;;  %v239_v36 = vld [vmem:[%s2335_s1 + $0x648] sm:$0xff]  ;;  %v1425_v38 = vpack.c.bf16 %v287_v31, %v286_v30  ;;  %v256_v40 = vld [vmem:[%s2335_s1 + $0x6d0] sm:$0xff] }
  0x6b   :  { %1416 = vmatpush3.bf16.msra.mxu1 %v1415_v9  ;;  %v270_v37 = vld [vmem:[%s2335_s1 + $0x740] sm:$0xff]  ;;  %v271_v39 = vld [vmem:[%s2335_s1 + $0x748] sm:$0xff]  ;;  %v257_v41 = vld [vmem:[%s2335_s1 + $0x6d8] sm:$0xff]  ;;  %v1395_v44 = vpack.c.bf16 %v239_v36, %v238_v35 }
  0x6c   :  { %1418 = vmatprep.subr.bf16.mxu1 %v1417_v14  ;;  %v288_v42 = vld [vmem:[%s2335_s1 + $0x7d0] sm:$0xff]  ;;  %v289_v43 = vld [vmem:[%s2335_s1 + $0x7d8] sm:$0xff]  ;;  %v1427_v45 = vpack.c.bf16 %v271_v39, %v270_v37  ;;  %v1397_v46 = vpack.c.bf16 %v257_v41, %v256_v40  ;;  %v258_v52 = vld [vmem:[%s2335_s1 + $0x6e0] sm:$0xff] }
  0x6d   :  { %1388 = vmatpush3.bf16.msra.mxu0 %v1387_v20  ;;  %v240_v47 = vld [vmem:[%s2335_s1 + $0x650] sm:$0xff]  ;;  %v241_v48 = vld [vmem:[%s2335_s1 + $0x658] sm:$0xff]  ;;  %v1429_v50 = vpack.c.bf16 %v289_v43, %v288_v42  ;;  %v259_v53 = vld [vmem:[%s2335_s1 + $0x6e8] sm:$0xff] }
  0x6e   :  { %1390 = vmatprep.subr.bf16.mxu0 %v1389_v22  ;;  %v272_v49 = vld [vmem:[%s2335_s1 + $0x750] sm:$0xff]  ;;  %v273_v51 = vld [vmem:[%s2335_s1 + $0x758] sm:$0xff]  ;;  %v290_v54 = vld [vmem:[%s2335_s1 + $0x7e0] sm:$0xff]  ;;  %v1399_v56 = vpack.c.bf16 %v241_v48, %v240_v47  ;;  %v1401_v58 = vpack.c.bf16 %v259_v53, %v258_v52 }
  0x6f   :  { %1420 = vmatpush3.bf16.msra.mxu1 %v1419_v21  ;;  %v291_v55 = vld [vmem:[%s2335_s1 + $0x7e8] sm:$0xff]  ;;  %v1431_v57 = vpack.c.bf16 %v273_v51, %v272_v49  ;;  %v242_v59 = vld [vmem:[%s2335_s1 + $0x660] sm:$0xff]  ;;  %v260_v0 = vld [vmem:[%s2335_s1 + $0x6f0] sm:$0xff] }
  0x70   :  { %1422 = vmatprep.subr.bf16.mxu1 %v1421_v26  ;;  %v243_v60 = vld [vmem:[%s2335_s1 + $0x668] sm:$0xff]  ;;  %v274_v61 = vld [vmem:[%s2335_s1 + $0x760] sm:$0xff]  ;;  %v1433_v62 = vpack.c.bf16 %v291_v55, %v290_v54  ;;  %v261_v1 = vld [vmem:[%s2335_s1 + $0x6f8] sm:$0xff]  ;;  %v880_v54 = vlaneseq }
  0x71   :  { %1392 = vmatpush3.bf16.msra.mxu0 %v1391_v32  ;;  %v275_v63 = vld [vmem:[%s2335_s1 + $0x768] sm:$0xff]  ;;  %v292_v2 = vld [vmem:[%s2335_s1 + $0x7f0] sm:$0xff]  ;;  %v293_v3 = vld [vmem:[%s2335_s1 + $0x7f8] sm:$0xff]  ;;  %v1403_v4 = vpack.c.bf16 %v243_v60, %v242_v59  ;;  %v1405_v6 = vpack.c.bf16 %v261_v1, %v260_v0 }
  0x72   :  { %1394 = vmatprep.subr.bf16.mxu0 %v1393_v34  ;;  %v1435_v5 = vpack.c.bf16 %v275_v63, %v274_v61  ;;  %v244_v7 = vld [vmem:[%s2335_s1 + $0x670] sm:$0xff]  ;;  %v245_v8 = vld [vmem:[%s2335_s1 + $0x678] sm:$0xff]  ;;  %v1437_v9 = vpack.c.bf16 %v293_v3, %v292_v2  ;;  %v34_v14 = vld [vmem:[%s2334_s0 + $0x60] sm:$0xff]  ;;  %v881_v55 = vand.u32 127, %v880_v54 }
  0x73   :  { %1424 = vmatpush3.bf16.msra.mxu1 %v1423_v33  ;;  %v276_v10 = vld [vmem:[%s2335_s1 + $0x770] sm:$0xff]  ;;  %v277_v11 = vld [vmem:[%s2335_s1 + $0x778] sm:$0xff]  ;;  %v1407_v12 = vpack.c.bf16 %v245_v8, %v244_v7  ;;  %v903_v17 = vld [vmem:[%s2336_s2] ss:$0 sm:$0xff] }
  0x74   :  { %1426 = vmatprep.subr.bf16.mxu1 %v1425_v38  ;;  %v1439_v13 = vpack.c.bf16 %v277_v11, %v276_v10  ;;  %v36_v15 = vld [vmem:[%s2334_s0 + $0x70] sm:$0xff] }
  0x75   :  { %1396 = vmatpush3.bf16.msra.mxu0 %v1395_v44 }
  0x76   :  { %1398 = vmatprep.subr.bf16.mxu0 %v1397_v46 }
  0x77   :  { %1428 = vmatpush3.bf16.msra.mxu1 %v1427_v45 }
  0x78   :  { %1430 = vmatprep.subr.bf16.mxu1 %v1429_v50  ;;  %v904_v50 = vld [vmem:[%s2337_s3] ss:$0 sm:$0xff]  ;;  %s1442_s3 = scalar_lea.vmem %s896_s16, 16 }
  0x79   :  { %1400 = vmatpush3.bf16.msra.mxu0 %v1399_v56  ;;  %v883_v56 = vshrl.u32 %v880_v54, 7  ;;  %p1443_p0 = scmp.ne.s32.totalorder %s896_s16, %s1442_s3  ;;  %p1448_p2 = scmp.lt.s32.totalorder %s1446_s17, %s1442_s3 }
  0x7a   :  { %1402 = vmatprep.subr.bf16.mxu0 %v1401_v58 }
  0x7b   :  { %1432 = vmatpush3.bf16.msra.mxu1 %v1431_v57  ;;  %v877_v57 = vstv %s2338_s4  ;;  %v884_v58 = vsub.s32 %v881_v55, %v883_v56  ;;  %p1449_p3 = por %p1448_p2, %p1447_p1 }
  0x7c   :  { %1434 = vmatprep.subr.bf16.mxu1 %v1433_v62 }
  0x7d   :  { %1404 = vmatpush3.bf16.msra.mxu0 %v1403_v4  ;;  %p1450_p4 = pnand %p1449_p3, %p1443_p0 }
  0x7e   :  { %1406 = vmatprep.subr.bf16.mxu0 %v1405_v6 }
  0x7f   :  { %1436 = vmatpush3.bf16.msra.mxu1 %v1435_v5 }
  0x80   :  { %1438 = vmatprep.subr.bf16.mxu1 %v1437_v9 }
  0x81   :  { %1408 = vmatpush3.bf16.msra.mxu0 %v1407_v12 }
  0x83   :  { %1440 = vmatpush3.bf16.msra.mxu1 %v1439_v13 }
  0x84   :  { %786 = vmatmul.mubr.f32.vlgmr.msra.gmra.mrb[6].mxu0 %v34_v14 }
  0x86   :  { %856 = vmatmul.mubr.f32.vlgmr.msra.gmra.mrb[6].mxu1 %v36_v15 }
  0xf7   :  { %v937_v16 = vpop.f32.mrb[0].mxu0 }
  0xf8   :  { %v938_v18 = vpop.f32.mrb[1].mxu0 }
  0xf9   :  { %v972_v19 = vpop.f32.mrb[0].mxu1  ;;  %v939_v20 = vadd.f32 %v938_v18, %v937_v16 }
  0xfa   :  { %v973_v21 = vpop.f32.mrb[1].mxu1 }
  0xfb   :  { %v974_v22 = vadd.f32 %v973_v21, %v972_v19  ;;  %v368_v23 = vadd.f32 %v939_v20, %v903_v17 }
  0xfd   :  { %v438_v24 = vadd.f32 %v974_v22, %v368_v23 }
 0x117   :  { %v1007_v25 = vpop.f32.mrb[2].mxu0 }
 0x118   :  { %v1008_v26 = vpop.f32.mrb[3].mxu0 }
 0x119   :  { %v1042_v27 = vpop.f32.mrb[2].mxu1  ;;  %v1009_v28 = vadd.f32 %v1008_v26, %v1007_v25 }
 0x11a   :  { %v1043_v29 = vpop.f32.mrb[3].mxu1 }
 0x11b   :  { %v1044_v30 = vadd.f32 %v1043_v29, %v1042_v27  ;;  %v508_v31 = vadd.f32 %v1009_v28, %v438_v24 }
 0x11d   :  { %v578_v32 = vadd.f32 %v1044_v30, %v508_v31 }
 0x137   :  { %v1077_v33 = vpop.f32.mrb[4].mxu0 }
 0x138   :  { %v1078_v34 = vpop.f32.mrb[5].mxu0 }
 0x139   :  { %v1112_v35 = vpop.f32.mrb[4].mxu1  ;;  %v1079_v36 = vadd.f32 %v1078_v34, %v1077_v33 }
 0x13a   :  { %v1113_v37 = vpop.f32.mrb[5].mxu1 }
 0x13b   :  { %v1114_v38 = vadd.f32 %v1113_v37, %v1112_v35  ;;  %v648_v39 = vadd.f32 %v1079_v36, %v578_v32 }
 0x13d   :  { %v718_v40 = vadd.f32 %v1114_v38, %v648_v39 }
 0x157   :  { %v1147_v41 = vpop.f32.mrb[6].mxu0 }
 0x158   :  { %v1148_v42 = vpop.f32.mrb[7].mxu0 }
 0x159   :  { %v1182_v43 = vpop.f32.mrb[6].mxu1  ;;  %v1149_v44 = vadd.f32 %v1148_v42, %v1147_v41 }
 0x15a   :  { %v1183_v45 = vpop.f32.mrb[7].mxu1 }
 0x15b   :  { %v1184_v46 = vadd.f32 %v1183_v45, %v1182_v43  ;;  %v788_v47 = vadd.f32 %v1149_v44, %v718_v40 }
 0x15d   :  { %v858_v48 = vadd.f32 %v1184_v46, %v788_v47 }
 0x15f   :  { %v862_v49 = vmul.f32 0.2, %v858_v48  ;;  %vm861_vm0 = vcmp.ge.f32.partialorder %v858_v48, 0.0 }
 0x161   :  { %v863_v51 = vsel %vm861_vm0, %v858_v48, %v862_v49 }
 0x162   :  { %v871_v52 = vmul.f32 %v904_v50, %v863_v51 }
 0x164   :  { %v873_v53 = vsel %vm872_vm1, %v871_v52, 0.0 }
 0x165   :  { %874 = vadd.xlane.f32.xlu0 %v873_v53 }
 0x1f2   :  { %v875_v59 = vpop.xlane.xlu0 %874 }
 0x1f3   :  { %v878_v60 = vadd.f32 %v877_v57, %v875_v59 }
 0x1f5   :  { %v885_v61 = vrot.slane %v878_v60, %v884_v58 }
 0x1f7   :  { %888 = vst.msk [vmem:[#allocation3] sm:$0x1] %vm887_vm2, %v885_v61 }
 0x1f8   :  { %1453 = shalt.err (!%p1450_p4)
}
 0x1f9   :  { %s1454_s4 = scalar_lea.hbm %s2339_s5, 16 }
 0x1fa   :  { %p1455_p5 = scmp.ne.s32.totalorder %s2339_s5, %s1454_s4  ;;  %p1458_p6 = scmp.lt.u32.totalorder %s1454_s4, %s2339_s5 }
 0x1fc   :  { %p1460_p7 = pnand %p1458_p6, %p1455_p5 }
 0x1fe   :  { %1463 = shalt.err (!%p1460_p7)
}
 0x1ff   :  { %898 = dma.vmem_to_hbm [thread:$0]  %s896_s16, 16, %s2339_s5, [#allocation4]  }
 0x200   :  { %1464 = dma.done.wait [#allocation4], 16  }
 0x201   :  { %1465 = vsyncadd [#allocation4], 4294967280 }
 0x202   :  { %902 = vsyncpa [#allocation4], 1 }

</bundles_post_ra>
